<compile_context>
chip_gen: v7x
topology: tpu7x:2x2x1
jax: 0.10.0
libtpu: 0.0.40
codegen_flags: <defaults>
</compile_context>

<pallas_src>
import functools

import jax
import jax.numpy as jnp
from jax import lax
from jax.experimental import pallas as pl
from jax.experimental.pallas import tpu as pltpu


def _round_up(a, b):
    return (a + b - 1) // b * b


def _pow2_floor_128(v):
    """Largest power-of-two multiple of 128 that is <= v (minimum 128)."""
    p = 128
    while p * 2 <= v:
        p *= 2
    return p


def _hw_config():
    """Generation-aware tile defaults and scoped-VMEM budget."""
    try:
        kind = jax.devices()[0].device_kind.lower()
    except Exception:  # pragma: no cover - defensive
        kind = ""
    try:
        vmem_cap = int(pltpu.get_tpu_info().vmem_capacity_bytes)
    except Exception:  # pragma: no cover - defensive
        vmem_cap = 64 << 20
    if "v7" in kind:
        tm, tn = 512, 1024
    elif "v6" in kind:
        tm, tn = 1024, 1024
    elif "v5" in kind:
        tm, tn = 512, 512
    else:
        tm, tn = 512, 1024
    if vmem_cap >= (100 << 20):
        # v5e / v6e: 128 MiB physical VMEM -> use ~80% of it.
        budget = int(vmem_cap * 0.80)
    else:
        # v7x: 64 MiB per TC -> leave headroom for compiler scratch / sems.
        budget = min(int(vmem_cap * 0.85), 56 << 20)
    return tm, tn, budget


def _reward_head_kernel(x_ref, w1_ref, b1_ref, w2_ref, b2_ref, o_ref, acc_ref,
                        *, tn):
    # x_ref:  (TM, H)   bf16 token tile (full input-hidden on lanes)
    # w1_ref: (H, TN)   dense-weight chunk, pre-transposed to (in, out) layout
    # b1_ref: (1, TN)   f32 dense-bias chunk
    # w2_ref: (Hp, LP)  FULL out_proj weight (resident; tiny), (in, out) layout
    # b2_ref: (1, LP)   f32 out_proj bias (padded to 128 lanes)
    # o_ref:  (TM, LP)  output tile
    # acc_ref:(TM, LP)  f32 accumulator, resident across the chunk axis
    n = pl.program_id(1)

    @pl.when(n == 0)
    def _():
        acc_ref[...] = jnp.zeros_like(acc_ref)

    # h_chunk = tanh(x @ W1_chunk + b1_chunk); f32 MXU accumulation, f32 tanh.
    h = jnp.dot(x_ref[...], w1_ref[...], preferred_element_type=jnp.float32)
    h = jnp.tanh(h + b1_ref[...])

    # Partial contribution of this hidden chunk: acc += h_chunk @ W2_chunk.
    # W2 stays resident; slice the (tn, LP) chunk out of VMEM (no extra DMA).
    off = pl.multiple_of(n * tn, tn)
    w2_chunk = w2_ref[pl.ds(off, tn), :]
    acc_ref[...] += jnp.dot(h.astype(w2_ref.dtype), w2_chunk,
                            preferred_element_type=jnp.float32)

    @pl.when(n == pl.num_programs(1) - 1)
    def _():
        o_ref[...] = (acc_ref[...] + b2_ref[...]).astype(o_ref.dtype)


def prepare_reward_head_weights(w_dense, b_dense, w_out, b_out, *,
                                tn=None, compute_dtype=jnp.bfloat16):
    """Cast / pad / transpose weights ONCE (hoist out of the per-call path).

    Returns (prepared_arrays, meta).  Call this at model-init time and reuse
    the result for every forward call: it removes the per-call H^2 HBM
    read+write the old wrapper emitted.
    """
    H, H2 = w_dense.shape
    L, H3 = w_out.shape
    assert H == H2 == H3, "weight shapes must be (H, H) and (L, H)"

    tn_default = _hw_config()[1] if tn is None else tn
    tn_eff = _pow2_floor_128(min(max(tn_default, 128), _round_up(H, 128)))
    Hp = _round_up(H, tn_eff)                 # padded intermediate-hidden dim
    LP = max(128, _round_up(L, 128))          # lane-dense output width

    # (in, out) layouts so both kernel matmuls are canonical (m,k)x(k,n).
    w1p = jnp.pad(w_dense.T.astype(compute_dtype), ((0, 0), (0, Hp - H)))
    b1p = jnp.pad(b_dense.astype(jnp.float32).reshape(1, H),
                  ((0, 0), (0, Hp - H)))
    w2p = jnp.pad(w_out.T.astype(compute_dtype), ((0, Hp - H), (0, LP - L)))
    b2p = jnp.pad(b_out.astype(jnp.float32).reshape(1, L),
                  ((0, 0), (0, LP - L)))

    meta = dict(H=H, L=L, Hp=Hp, LP=LP, tn=tn_eff, compute_dtype=compute_dtype)
    return (w1p, b1p, w2p, b2p), meta


def llama_reward_head_apply(hidden_states, prepared, meta, *, tm=None):
    """hidden_states: [B, S, H]; prepared/meta from prepare_reward_head_weights.
    Returns [B, S, n_labels]."""
    B, S, H = hidden_states.shape
    assert H == meta["H"]
    w1p, b1p, w2p, b2p = prepared
    Hp, LP, L = meta["Hp"], meta["LP"], meta["L"]
    tn_eff = meta["tn"]
    cdt = meta["compute_dtype"]
    out_dtype = hidden_states.dtype

    tm_default, _, budget = _hw_config()
    if tm is None:
        tm = tm_default

    M = B * S
    # Token tile: multiple of 16 sublanes (bf16 packing); no bigger than M.
    tm_eff = _round_up(min(tm, _round_up(M, 16)), 16)

    bpe = jnp.dtype(cdt).itemsize
    obpe = jnp.dtype(out_dtype).itemsize

    def vmem_need(tm_, tn_):
        return int(2 * tm_ * H * bpe           # x tile (double buffered)
                   + 2 * H * tn_ * bpe         # W1 chunk (double buffered)
                   + 2 * tn_ * 4               # b1 chunk
                   + 2 * Hp * LP * bpe         # resident W2 (conservative x2)
                   + 2 * LP * 4                # b2
                   + 2 * tm_ * LP * obpe       # out tile
                   + tm_ * LP * 4)             # f32 accumulator scratch

    # Shrink tiles to fit the per-generation VMEM budget (tn first, then tm).
    # tn_eff is a power-of-two multiple of 128, so halving keeps Hp divisible.
    while vmem_need(tm_eff, tn_eff) + (4 << 20) > budget:
        if tn_eff > 256:
            tn_eff //= 2
        elif tm_eff > 256:
            tm_eff = _round_up(tm_eff // 2, 16)
        else:
            break

    Mp = _round_up(M, tm_eff)
    x = hidden_states.reshape(M, H).astype(cdt)
    if Mp != M:
        x = jnp.pad(x, ((0, Mp - M), (0, 0)))

    grid = (Mp // tm_eff, Hp // tn_eff)
    vmem_limit = int(min(max(vmem_need(tm_eff, tn_eff) + (4 << 20), 32 << 20),
                         budget))

    kernel = functools.partial(_reward_head_kernel, tn=tn_eff)

    out = pl.pallas_call(
        kernel,
        out_shape=jax.ShapeDtypeStruct((Mp, LP), out_dtype),
        grid_spec=pltpu.PrefetchScalarGridSpec(
            num_scalar_prefetch=0,
            grid=grid,
            in_specs=[
                pl.BlockSpec((tm_eff, H), lambda i, n: (i, 0)),    # x token tile
                pl.BlockSpec((H, tn_eff), lambda i, n: (0, n)),    # W1 chunk
                pl.BlockSpec((1, tn_eff), lambda i, n: (0, n)),    # b1 chunk
                pl.BlockSpec((Hp, LP), lambda i, n: (0, 0)),       # W2 resident
                pl.BlockSpec((1, LP), lambda i, n: (0, 0)),        # b2
            ],
            out_specs=pl.BlockSpec((tm_eff, LP), lambda i, n: (i, 0)),
            scratch_shapes=[pltpu.VMEM((tm_eff, LP), jnp.float32)],
        ),
        compiler_params=pltpu.CompilerParams(
            dimension_semantics=("parallel", "arbitrary"),
            vmem_limit_bytes=vmem_limit),
    )(x, w1p, b1p, w2p, b2p)

    return out[:M, :L].reshape(B, S, L)


def llama_reward_head(hidden_states, w_dense, b_dense, w_out, b_out, *,
                      tm=None, tn=None, compute_dtype=jnp.bfloat16):
    """One-shot convenience wrapper.  For repeated calls, hoist
    prepare_reward_head_weights() to init time and call
    llama_reward_head_apply() directly."""
    prepared, meta = prepare_reward_head_weights(
        w_dense, b_dense, w_out, b_out, tn=tn, compute_dtype=compute_dtype)
    return llama_reward_head_apply(hidden_states, prepared, meta, tm=tm)


if __name__ == "__main__":
    # Small shapes consistent with the module: batch=2, seq=8, hidden=32, n_labels=5
    B, S, H, L = 2, 8, 32, 5
    key = jax.random.PRNGKey(0)
    k_x, k_w1, k_b1, k_w2, k_b2 = jax.random.split(key, 5)

    hidden_states = jax.random.normal(k_x, (B, S, H), dtype=jnp.float32)
    # torch nn.Linear layout: weight is (out_features, in_features)
    w_dense = jax.random.normal(k_w1, (H, H), dtype=jnp.float32) * 0.05
    b_dense = jax.random.normal(k_b1, (H,), dtype=jnp.float32) * 0.05
    w_out = jax.random.normal(k_w2, (L, H), dtype=jnp.float32) * 0.05
    b_out = jax.random.normal(k_b2, (L,), dtype=jnp.float32) * 0.05

    # Hoisted (once-per-model) weight preparation, then the kernel call.
    prepared, meta = prepare_reward_head_weights(w_dense, b_dense, w_out, b_out)
    out = jax.block_until_ready(
        llama_reward_head_apply(hidden_states, prepared, meta))
    assert out.shape == (B, S, L)

    # Pure-JAX reference with matching bf16 operand casts / f32 accumulation.
    xb = hidden_states.astype(jnp.bfloat16).astype(jnp.float32)
    w1b = w_dense.astype(jnp.bfloat16).astype(jnp.float32)
    w2b = w_out.astype(jnp.bfloat16).astype(jnp.float32)
    h = jnp.tanh(jnp.einsum("bsh,oh->bso", xb, w1b) + b_dense)
    hb = h.astype(jnp.bfloat16).astype(jnp.float32)
    ref = jnp.einsum("bsh,oh->bso", hb, w2b) + b_out

    assert jnp.allclose(out.astype(jnp.float32), ref, atol=1e-2, rtol=1e-2), \
        "mismatch vs reference"
    print("KERNEL_OK")
</pallas_src>

<mosaic_0001>
module attributes {stable_mosaic.version = 11 : i64} {
  func.func @_reward_head_kernel(%arg0: i32, %arg1: i32, %arg2: memref<16x32xbf16, #tpu.memory_space<vmem>>, %arg3: memref<32x128xbf16, #tpu.memory_space<vmem>>, %arg4: memref<1x128xf32, #tpu.memory_space<vmem>>, %arg5: memref<128x128xbf16, #tpu.memory_space<vmem>>, %arg6: memref<1x128xf32, #tpu.memory_space<vmem>>, %arg7: memref<16x128xf32, #tpu.memory_space<vmem>>, %arg8: memref<16x128xf32, #tpu.memory_space<vmem>>) attributes {dimension_semantics = [#tpu.dimension_semantics<parallel>, #tpu.dimension_semantics<arbitrary>], iteration_bounds = array<i64: 1, 1>, scalar_prefetch = 0 : i64, scratch_operands = 1 : i64, tpu.core_type = #tpu.core_type<tc>, window_params = [{transform_indices = @transform_0, window_bounds = array<i64: 16, 32>}, {transform_indices = @transform_1, window_bounds = array<i64: 32, 128>}, {transform_indices = @transform_2, window_bounds = array<i64: 1, 128>}, {pipeline_mode = #tpu.pipeline_mode<synchronous>, transform_indices = @transform_3, window_bounds = array<i64: 128, 128>}, {pipeline_mode = #tpu.pipeline_mode<synchronous>, transform_indices = @transform_4, window_bounds = array<i64: 1, 128>}, {transform_indices = @transform_5, window_bounds = array<i64: 16, 128>}]} {
    %c0_i32 = arith.constant 0 : i32
    %0 = arith.cmpi eq, %arg1, %c0_i32 : i32
    %1 = arith.extui %0 : i1 to i32
    %c0_i32_0 = arith.constant 0 : i32
    %2 = arith.cmpi ne, %1, %c0_i32_0 : i32
    scf.if %2 {
      %cst_14 = arith.constant 0.000000e+00 : f32
      %22 = vector.broadcast %cst_14 : f32 to vector<16x128xf32>
      %c0_15 = arith.constant 0 : index
      %c0_16 = arith.constant 0 : index
      %23 = vector.load %arg8[%c0_15, %c0_16] : memref<16x128xf32, #tpu.memory_space<vmem>>, vector<16x128xf32>
      tpu.vector_store %arg8[%c0_15, %c0_16], %22 {strides = array<i32>} : memref<16x128xf32, #tpu.memory_space<vmem>>, vector<16x128xf32>,
    } else {
    }
    %c0 = arith.constant 0 : index
    %c0_1 = arith.constant 0 : index
    %3 = vector.load %arg2[%c0, %c0_1] : memref<16x32xbf16, #tpu.memory_space<vmem>>, vector<16x32xbf16>
    %c0_2 = arith.constant 0 : index
    %c0_3 = arith.constant 0 : index
    %4 = vector.load %arg3[%c0_2, %c0_3] : memref<32x128xbf16, #tpu.memory_space<vmem>>, vector<32x128xbf16>
    %cst = arith.constant dense<0.000000e+00> : vector<16x128xf32>
    %5 = tpu.matmul %3, %4, %cst {dimension_numbers = #tpu.dot_dimension_numbers<[1], [0], [0], [1], [0, 0, 1, 1], [], []>} : vector<16x32xbf16>, vector<32x128xbf16>, vector<16x128xf32> -> vector<16x128xf32>
    %c0_4 = arith.constant 0 : index
    %c0_5 = arith.constant 0 : index
    %6 = vector.load %arg4[%c0_4, %c0_5] : memref<1x128xf32, #tpu.memory_space<vmem>>, vector<1x128xf32>
    %7 = vector.broadcast %6 : vector<1x128xf32> to vector<16x128xf32>
    %8 = arith.addf %5, %7 : vector<16x128xf32>
    %9 = math.tanh %8 : vector<16x128xf32>
    %c128_i32 = arith.constant 128 : i32
    %10 = arith.muli %arg1, %c128_i32 : i32
    %11 = tpu.assume_multiple %10, 128 : i32
    %12 = arith.index_cast %11 : i32 to index
    %c0_6 = arith.constant 0 : index
    %13 = vector.load %arg5[%12, %c0_6] : memref<128x128xbf16, #tpu.memory_space<vmem>>, vector<128x128xbf16>
    %c0_7 = arith.constant 0 : index
    %c0_8 = arith.constant 0 : index
    %14 = vector.load %arg8[%c0_7, %c0_8] : memref<16x128xf32, #tpu.memory_space<vmem>>, vector<16x128xf32>
    %15 = arith.truncf %9 : vector<16x128xf32> to vector<16x128xbf16>
    %cst_9 = arith.constant dense<0.000000e+00> : vector<16x128xf32>
    %16 = tpu.matmul %15, %13, %cst_9 {dimension_numbers = #tpu.dot_dimension_numbers<[1], [0], [0], [1], [0, 0, 1, 1], [], []>} : vector<16x128xbf16>, vector<128x128xbf16>, vector<16x128xf32> -> vector<16x128xf32>
    %17 = arith.addf %14, %16 : vector<16x128xf32>
    %c0_10 = arith.constant 0 : index
    %c0_11 = arith.constant 0 : index
    %18 = vector.load %arg8[%c0_10, %c0_11] : memref<16x128xf32, #tpu.memory_space<vmem>>, vector<16x128xf32>
    tpu.vector_store %arg8[%c0_10, %c0_11], %17 {strides = array<i32>} : memref<16x128xf32, #tpu.memory_space<vmem>>, vector<16x128xf32>,
    %c0_i32_12 = arith.constant 0 : i32
    %19 = arith.cmpi eq, %arg1, %c0_i32_12 : i32
    %20 = arith.extui %19 : i1 to i32
    %c0_i32_13 = arith.constant 0 : i32
    %21 = arith.cmpi ne, %20, %c0_i32_13 : i32
    scf.if %21 {
      %c0_14 = arith.constant 0 : index
      %c0_15 = arith.constant 0 : index
      %22 = vector.load %arg8[%c0_14, %c0_15] : memref<16x128xf32, #tpu.memory_space<vmem>>, vector<16x128xf32>
      %c0_16 = arith.constant 0 : index
      %c0_17 = arith.constant 0 : index
      %23 = vector.load %arg6[%c0_16, %c0_17] : memref<1x128xf32, #tpu.memory_space<vmem>>, vector<1x128xf32>
      %24 = vector.broadcast %23 : vector<1x128xf32> to vector<16x128xf32>
      %25 = arith.addf %22, %24 : vector<16x128xf32>
      %c0_18 = arith.constant 0 : index
      %c0_19 = arith.constant 0 : index
      %26 = vector.load %arg7[%c0_18, %c0_19] : memref<16x128xf32, #tpu.memory_space<vmem>>, vector<16x128xf32>
      tpu.vector_store %arg7[%c0_18, %c0_19], %25 {strides = array<i32>} : memref<16x128xf32, #tpu.memory_space<vmem>>, vector<16x128xf32>,
    } else {
    }
    return
  }
  func.func @transform_0(%arg0: i32, %arg1: i32) -> (i32, i32) {
    %c0_i32 = arith.constant 0 : i32
    %c0_i32_0 = arith.constant 0 : i32
    return %arg0, %c0_i32 : i32, i32
  }
  func.func @transform_1(%arg0: i32, %arg1: i32) -> (i32, i32) {
    %c0_i32 = arith.constant 0 : i32
    %c0_i32_0 = arith.constant 0 : i32
    return %c0_i32, %arg1 : i32, i32
  }
  func.func @transform_2(%arg0: i32, %arg1: i32) -> (i32, i32) {
    %c0_i32 = arith.constant 0 : i32
    %c0_i32_0 = arith.constant 0 : i32
    return %c0_i32, %arg1 : i32, i32
  }
  func.func @transform_3(%arg0: i32, %arg1: i32) -> (i32, i32) {
    %c0_i32 = arith.constant 0 : i32
    %c0_i32_0 = arith.constant 0 : i32
    %c0_i32_1 = arith.constant 0 : i32
    return %c0_i32, %c0_i32_0 : i32, i32
  }
  func.func @transform_4(%arg0: i32, %arg1: i32) -> (i32, i32) {
    %c0_i32 = arith.constant 0 : i32
    %c0_i32_0 = arith.constant 0 : i32
    %c0_i32_1 = arith.constant 0 : i32
    return %c0_i32, %c0_i32_0 : i32, i32
  }
  func.func @transform_5(%arg0: i32, %arg1: i32) -> (i32, i32) {
    %c0_i32 = arith.constant 0 : i32
    %c0_i32_0 = arith.constant 0 : i32
    return %arg0, %c0_i32 : i32, i32
  }
}

</mosaic_0001>

<bundles_post_ra>
// kernel: tpu_custom_call.1
= control target key start
LH: loop header
LB: loop body
LE: loop exit
PB: predicated region body
PF: predicated region fallthrough
CT: control target
= control target key end

     0   :  { %10 = vsyncpa [#allocation4], 0  ;;  %s582_s0 = inlined_call_operand.hbm [shape: bf16[16,32], index: 0, kind: input, shape index: {}]   ;;  %s583_s1 = inlined_call_operand.hbm [shape: bf16[32,128], index: 1, kind: input, shape index: {}]   ;;  %s584_s2 = inlined_call_operand.vmem [shape: f32[1,128], index: 2, kind: input, shape index: {}]   ;;  %s585_s3 = inlined_call_operand.hbm [shape: bf16[128,128], index: 3, kind: input, shape index: {}]   ;;  %s586_s4 = inlined_call_operand.vmem [shape: f32[1,128], index: 4, kind: input, shape index: {}]   ;;  %s587_s5 = inlined_call_operand.hbm [shape: f32[16,128], index: 5, kind: output, shape index: {}]  }
   0x1   :  { %11 = vsyncpa [#allocation7], 0 }
   0x2   :  { %12 = vsyncpa [#allocation5], 0  ;;  %s472_s18 = smov [#allocation6]   ;;  %s473_s20 = smov [#allocation3]  }
   0x3   :  { %s30_s19 = sshll.u32 %s472_s18, 4  ;;  %s18_s21 = sshll.u32 %s473_s20, 4  ;;  %s31_s19 = int_to_ptr.vmem [resolvable:$true] %s30_s19  ;;  %s512_s21 = int_to_ptr.vmem [resolvable:$true] %s18_s21 }
   0x4   :  { %s378_s24 = scalar_lea.hbm %s583_s1, 256 }
   0x5   :  { %p379_p0 = scmp.ne.s32.totalorder %s583_s1, %s378_s24  ;;  %p382_p1 = scmp.lt.u32.totalorder %s378_s24, %s583_s1 }
   0x7   :  { %p384_p2 = pnand %p382_p1, %p379_p0 }
   0x9   :  { %387 = shalt.err (!%p384_p2)
}
   0xa   :  { %s388_s29 = scalar_lea.vmem %s31_s19, 256  ;;  %p393_p4 = scmp.lt.s32.totalorder %s31_s19, %s31_s19 }
   0xb   :  { %p389_p3 = scmp.ne.s32.totalorder %s31_s19, %s388_s29  ;;  %p394_p5 = scmp.lt.s32.totalorder %s388_s29, %s388_s29 }
   0xd   :  { %p395_p6 = por %p394_p5, %p393_p4 }
   0xf   :  { %p396_p7 = pnand %p395_p6, %p389_p3 }
  0x11   :  { %399 = shalt.err (!%p396_p7)
}
  0x12   :  { %s474_s30 = smov 64   ;;  %s475_s6 = smov 4  }
  0x13   :  { %36 = dma.hbm_to_vmem [thread:$0]  %s583_s1, 256, %s31_s19, [#allocation7], %s474_s30, %s474_s30, %s475_s6  }
  0x14   :  { %s400_s11 = scalar_lea.hbm %s582_s0, 128 }
  0x15   :  { %p401_p8 = scmp.ne.s32.totalorder %s582_s0, %s400_s11  ;;  %p404_p9 = scmp.lt.u32.totalorder %s400_s11, %s582_s0 }
  0x17   :  { %p406_p10 = pnand %p404_p9, %p401_p8 }
  0x19   :  { %409 = shalt.err (!%p406_p10)
}
  0x1a   :  { %s410_s16 = scalar_lea.vmem %s512_s21, 128  ;;  %p415_p12 = scmp.lt.s32.totalorder %s512_s21, %s512_s21 }
  0x1b   :  { %p411_p11 = scmp.ne.s32.totalorder %s512_s21, %s410_s16  ;;  %p416_p13 = scmp.lt.s32.totalorder %s410_s16, %s410_s16 }
  0x1d   :  { %p417_p0 = por %p416_p13, %p415_p12 }
  0x1f   :  { %p418_p1 = pnand %p417_p0, %p411_p11 }
  0x21   :  { %421 = shalt.err (!%p418_p1)
}
  0x22   :  { %24 = dma.hbm_to_vmem [thread:$0]  %s582_s0, 128, %s512_s21, [#allocation4], %s474_s30, %s474_s30, %s475_s6  }
  0x23   :  { %s476_s18 = smov [#allocation8]   ;;  %s422_s23 = scalar_lea.hbm %s585_s3, 1024 }
  0x24   :  { %s44_s19 = sshll.u32 %s476_s18, 4  ;;  %p423_p2 = scmp.ne.s32.totalorder %s585_s3, %s422_s23  ;;  %s45_s19 = int_to_ptr.vmem [resolvable:$true] %s44_s19 }
  0x25   :  { %p426_p3 = scmp.lt.u32.totalorder %s422_s23, %s585_s3 }
  0x27   :  { %p428_p4 = pnand %p426_p3, %p423_p2 }
  0x29   :  { %431 = shalt.err (!%p428_p4)
}
  0x2a   :  { %s432_s28 = scalar_lea.vmem %s45_s19, 1024  ;;  %p437_p6 = scmp.lt.s32.totalorder %s45_s19, %s45_s19 }
  0x2b   :  { %p433_p5 = scmp.ne.s32.totalorder %s45_s19, %s432_s28  ;;  %p438_p7 = scmp.lt.s32.totalorder %s432_s28, %s432_s28 }
  0x2d   :  { %p439_p8 = por %p438_p7, %p437_p6 }
  0x2f   :  { %p440_p9 = pnand %p439_p8, %p433_p5 }
  0x31   :  { %443 = shalt.err (!%p440_p9)
}
  0x32   :  { %50 = dma.hbm_to_vmem [thread:$0]  %s585_s3, 1024, %s45_s19, [#allocation7], %s474_s30, %s474_s30, %s475_s6  }
  0x33   :  { %466 = dma.done.wait [#allocation4], 128  }
  0x34   :  { %467 = vsyncadd [#allocation4], 4294967168 }
  0x35   :  { %468 = dma.done.wait [#allocation7], 1280  }
  0x36   :  { %469 = vsyncadd [#allocation7], 4294966016  ;;  %v477_v0 = vmov 0.0   ;;  %vm478_vm0 = vmmov 0   ;;  %v363_v1 = vld [vmem:[#allocation6] sm:$0xff]   ;;  %v364_v2 = vld [vmem:[#allocation6 + $0x8] sm:$0xff]  }
  0x37   :  { %325 = vmatprep.subr.bf16.mxu0 %v477_v0  ;;  %329 = vmatprep.mubr.msk.bf16.mxu0 %vm478_vm0, %v477_v0  ;;  %v366_v3 = vld [vmem:[#allocation8] sm:$0xff]   ;;  %v365_v4 = vld [vmem:[#allocation3] sm:$0xff]   ;;  %vm99_vm1 = vcmask 261120   ;;  %v368_v6 = vld [vmem:[#allocation8 + $0x10] sm:$0xff]   ;;  %s479_s7 = smov [#allocation9]  }
  0x38   :  { %333 = vmatprep.subr.bf16.mxu1 %v477_v0  ;;  %349 = vmatprep.mubr.msk.bf16.mxu1 %vm478_vm0, %v477_v0  ;;  %v367_v5 = vld [vmem:[#allocation8 + $0x8] sm:$0xff]   ;;  %v369_v7 = vld [vmem:[#allocation8 + $0x18] sm:$0xff]   ;;  %v370_v8 = vld [vmem:[#allocation8 + $0x20] sm:$0xff]   ;;  %s284_s8 = sshll.u32 %s479_s7, 4  ;;  %s285_s8 = int_to_ptr.vmem [resolvable:$true] %s284_s8 }
  0x39   :  { %326 = vmatpush3.bf16.msra.mxu0 %v363_v1  ;;  %334 = vmatpush3.bf16.msra.mxu1 %v366_v3  ;;  %v371_v9 = vld [vmem:[#allocation8 + $0x28] sm:$0xff]   ;;  %v372_v10 = vld [vmem:[#allocation8 + $0x30] sm:$0xff]   ;;  %v373_v11 = vld [vmem:[#allocation8 + $0x38] sm:$0xff]   ;;  %p449_p11 = scmp.lt.s32.totalorder %s285_s8, %s285_s8 }
  0x3a   :  { %327 = vmatprep.subr.bf16.mxu0 %v477_v0  ;;  %335 = vmatprep.subr.bf16.mxu1 %v477_v0  ;;  %v299_v12 = vld [vmem:[%s584_s2] ss:$0 sm:$0xff]  ;;  %s444_s2 = scalar_lea.vmem %s285_s8, 256 }
  0x3b   :  { %v312_v22 = vld [vmem:[%s586_s4] ss:$0 sm:$0xff]  ;;  %p445_p10 = scmp.ne.s32.totalorder %s285_s8, %s444_s2  ;;  %p450_p12 = scmp.lt.s32.totalorder %s444_s2, %s444_s2 }
  0x3d   :  { %328 = vmatpush3.bf16.msra.mxu0 %v364_v2  ;;  %336 = vmatpush3.bf16.msra.mxu1 %v367_v5  ;;  %p451_p13 = por %p450_p12, %p449_p11 }
  0x3e   :  { %337 = vmatprep.subr.bf16.mxu1 %v477_v0 }
  0x3f   :  { %p452_p0 = pnand %p451_p13, %p445_p10 }
  0x40   :  { %330 = vmatmul.mubr.msk.bf16.vlgmr.msra.gmra.mrb[0].mxu0 %vm99_vm1, %v365_v4 }
  0x41   :  { %338 = vmatpush3.bf16.msra.mxu1 %v368_v6 }
  0x42   :  { %339 = vmatprep.subr.bf16.mxu1 %v477_v0 }
  0x45   :  { %340 = vmatpush3.bf16.msra.mxu1 %v369_v7 }
  0x46   :  { %341 = vmatprep.subr.bf16.mxu1 %v477_v0 }
  0x49   :  { %342 = vmatpush3.bf16.msra.mxu1 %v370_v8 }
  0x4a   :  { %343 = vmatprep.subr.bf16.mxu1 %v477_v0 }
  0x4d   :  { %344 = vmatpush3.bf16.msra.mxu1 %v371_v9 }
  0x4e   :  { %345 = vmatprep.subr.bf16.mxu1 %v477_v0 }
  0x51   :  { %346 = vmatpush3.bf16.msra.mxu1 %v372_v10 }
  0x52   :  { %347 = vmatprep.subr.bf16.mxu1 %v477_v0 }
  0x55   :  { %348 = vmatpush3.bf16.msra.mxu1 %v373_v11 }
 0x113   :  { %v137_v13 = vpop.f32.mrb[0].mxu0 }
 0x114   :  { %v138_v14 = vadd.f32 %v299_v12, %v137_v13  ;;  %v331_v15 = vpop.f32.mrb[1].mxu0 }
 0x115   :  { %v140_v16 = vpop.f32.mrb[2].mxu0 }
 0x116   :  { %v141_v17 = vadd.f32 %v299_v12, %v140_v16  ;;  %v332_v18 = vpop.f32.mrb[3].mxu0  ;;  %374 = vtanh.f32 %v138_v14 }
 0x118   :  { %376 = vtanh.f32 %v141_v17 }
 0x120   :  { %v375_v19 = vpop.eup %374 }
 0x122   :  { %v377_v20 = vpop.eup %376 }
 0x123   :  { %v169_v21 = vpack.c.bf16 %v377_v20, %v375_v19 }
 0x125   :  { %350 = vmatmul.mubr.bf16.vlgmr.msra.gmra.mrb[0].mxu1 %v169_v21 }
 0x1f8   :  { %v252_v23 = vpop.f32.mrb[0].mxu1 }
 0x1f9   :  { %v275_v24 = vadd.f32 %v312_v22, %v252_v23  ;;  %v351_v25 = vpop.f32.mrb[1].mxu1 }
 0x1fa   :  { %v255_v26 = vpop.f32.mrb[2].mxu1 }
 0x1fb   :  { %277 = vst [vmem:[#allocation9] sm:$0xff] %v275_v24  ;;  %v276_v27 = vadd.f32 %v312_v22, %v255_v26  ;;  %v352_v28 = vpop.f32.mrb[3].mxu1 }
 0x1fd   :  { %278 = vst [vmem:[#allocation9 + $0x8] sm:$0xff] %v276_v27 }
 0x1fe   :  { %455 = shalt.err (!%p452_p0)
}
 0x1ff   :  { %s456_s10 = scalar_lea.hbm %s587_s5, 256 }
 0x200   :  { %p457_p1 = scmp.ne.s32.totalorder %s587_s5, %s456_s10  ;;  %p460_p2 = scmp.lt.u32.totalorder %s456_s10, %s587_s5 }
 0x202   :  { %p462_p3 = pnand %p460_p2, %p457_p1 }
 0x204   :  { %465 = shalt.err (!%p462_p3)
}
 0x205   :  { %s480_s15 = smov 128   ;;  %s481_s16 = smov 8  }
 0x206   :  { %290 = dma.vmem_to_hbm [thread:$0]  %s285_s8, 256, %s587_s5, [#allocation5], %s480_s15, %s480_s15, %s481_s16  }
 0x207   :  { %470 = dma.done.wait [#allocation5], 256  }
 0x208   :  { %471 = vsyncadd [#allocation5], 4294967040 }
 0x209   :  { %294 = vsyncpa [#allocation4], 1 }
 0x20a   :  { %295 = vsyncpa [#allocation7], 1 }
 0x20b   :  { %296 = vsyncpa [#allocation5], 1 }

</bundles_post_ra>
